<compile_context>
chip_gen: v7x
topology: tpu7x:2x2x1
jax: 0.10.0
libtpu: 0.0.40
codegen_flags: <defaults>
</compile_context>

<pallas_src>
import jax
import jax.numpy as jnp
from jax.experimental import pallas as pl
from jax.experimental.pallas import tpu as pltpu

DIM_C = 10
DIM_Z = 10
DIM_IN = DIM_Z + DIM_C        # 20
DIM_H = 256
DIM_IM = 784
DIM_IM_PAD = 896              # 7 * 128, lane-dense output width


def _round_up(x, m):
    return ((x + m - 1) // m) * m


def _g_mlp_kernel(x_ref, w1_ref, b1_ref, w2_ref, b2_ref, o_ref, h_ref):
    # Linear(20 -> 256) + ReLU   (bf16 MXU matmul, f32 accumulate + epilogue)
    x_bf = x_ref[...].astype(jnp.bfloat16)
    h = jnp.dot(x_bf, w1_ref[...], preferred_element_type=jnp.float32)
    h = jnp.maximum(h + b1_ref[...], 0.0)          # (TM, 256) + (1, 256)
    # Stage hidden activation through explicit VMEM scratch (bf16) so the
    # second matmul also runs the bf16 MXU path with predictable vreg pressure.
    h_ref[...] = h.astype(jnp.bfloat16)
    # Linear(256 -> 896 padded) + Sigmoid
    y = jnp.dot(h_ref[...], w2_ref[...], preferred_element_type=jnp.float32)
    y = y + b2_ref[...]                            # (TM, 896) + (1, 896)
    o_ref[...] = jax.nn.sigmoid(y).astype(o_ref.dtype)


def g_forward(x, w1, b1, w2, b2, *, tm=None):
    """Pallas implementation of G.forward: sigmoid(relu(x@W1+b1)@W2+b2)."""
    B = x.shape[0]
    # Batch tile: multiple of 8 sublanes, capped at 256 (fills v6e/v7x MXU,
    # 2x128 passes on v5e) while keeping the working set well under v7x VMEM.
    if tm is None:
        tm = min(256, _round_up(B, 8))
    pB = _round_up(B, tm)

    # Pad batch so every grid step is a full tile (tail rows are zeros).
    x_p = x if pB == B else jnp.pad(x, ((0, pB - B), (0, 0)))

    # Pad output features 784 -> 896 for lane-dense (multiple-of-128) stores.
    w2_p = jnp.pad(w2, ((0, 0), (0, DIM_IM_PAD - DIM_IM)))
    b2_p = jnp.pad(b2, ((0, DIM_IM_PAD - DIM_IM),))

    # bf16 weights: native MXU path, halves weight DMA. Biases stay f32.
    w1_bf = w1.astype(jnp.bfloat16)
    w2_bf = w2_p.astype(jnp.bfloat16)
    b1_2d = b1.reshape(1, DIM_H).astype(jnp.float32)
    b2_2d = b2_p.reshape(1, DIM_IM_PAD).astype(jnp.float32)

    grid = (pB // tm,)

    out_padded = pl.pallas_call(
        _g_mlp_kernel,
        out_shape=jax.ShapeDtypeStruct((pB, DIM_IM_PAD), jnp.float32),
        grid_spec=pltpu.PrefetchScalarGridSpec(
            num_scalar_prefetch=0,
            grid=grid,
            in_specs=[
                # batch-tiled activations
                pl.BlockSpec((tm, DIM_IN), lambda i: (i, 0)),
                # weights / biases: constant block -> stay VMEM-resident
                pl.BlockSpec((DIM_IN, DIM_H), lambda i: (0, 0)),
                pl.BlockSpec((1, DIM_H), lambda i: (0, 0)),
                pl.BlockSpec((DIM_H, DIM_IM_PAD), lambda i: (0, 0)),
                pl.BlockSpec((1, DIM_IM_PAD), lambda i: (0, 0)),
            ],
            out_specs=pl.BlockSpec((tm, DIM_IM_PAD), lambda i: (i, 0)),
            scratch_shapes=[pltpu.VMEM((tm, DIM_H), jnp.bfloat16)],
        ),
        compiler_params=pltpu.CompilerParams(
            dimension_semantics=("parallel",)),
    )(x_p, w1_bf, b1_2d, w2_bf, b2_2d)

    # Strip batch / feature padding outside the kernel.
    return out_padded[:B, :DIM_IM]


def init_params(key):
    """Deterministic init matching nn.Linear defaults: U(-1/sqrt(fan_in), 1/sqrt(fan_in))."""
    k1, k2, k3, k4 = jax.random.split(key, 4)
    bound1 = 1.0 / jnp.sqrt(DIM_IN)
    bound2 = 1.0 / jnp.sqrt(DIM_H)
    w1 = jax.random.uniform(k1, (DIM_IN, DIM_H), jnp.float32, -bound1, bound1)
    b1 = jax.random.uniform(k2, (DIM_H,), jnp.float32, -bound1, bound1)
    w2 = jax.random.uniform(k3, (DIM_H, DIM_IM), jnp.float32, -bound2, bound2)
    b2 = jax.random.uniform(k4, (DIM_IM,), jnp.float32, -bound2, bound2)
    return w1, b1, w2, b2


def _ref_forward_bf16(x, w1, b1, w2, b2):
    """Pure-JAX reference mirroring the kernel's bf16 casts (f32 accumulation)."""
    bf = jnp.bfloat16
    f32 = jnp.float32
    xb = x.astype(bf).astype(f32)
    w1b = w1.astype(bf).astype(f32)
    w2b = w2.astype(bf).astype(f32)
    h = jnp.maximum(xb @ w1b + b1, 0.0).astype(bf).astype(f32)
    return jax.nn.sigmoid(h @ w2b + b2)


def _ref_forward_f32(x, w1, b1, w2, b2):
    """Full-f32 reference of the original module semantics."""
    return jax.nn.sigmoid(jnp.maximum(x @ w1 + b1, 0.0) @ w2 + b2)


if __name__ == "__main__":
    key = jax.random.PRNGKey(0)
    kp, kx1, kx2 = jax.random.split(key, 3)
    w1, b1, w2, b2 = init_params(kp)

    # Small batch (launch-overhead regime) — z (10) ++ c (10)
    batch = 8
    x = jax.random.normal(kx1, (batch, DIM_IN), jnp.float32)
    out = jax.block_until_ready(g_forward(x, w1, b1, w2, b2))
    assert out.shape == (batch, DIM_IM)
    ref_bf = _ref_forward_bf16(x, w1, b1, w2, b2)
    ref_f32 = _ref_forward_f32(x, w1, b1, w2, b2)
    assert jnp.allclose(out, ref_bf, atol=2e-3), "mismatch vs bf16-matched reference"
    assert jnp.allclose(out, ref_f32, atol=5e-2), "mismatch vs f32 reference"

    # Larger, non-tile-aligned batch exercises the tiled grid + padding path.
    batch2 = 300
    x2 = jax.random.normal(kx2, (batch2, DIM_IN), jnp.float32)
    out2 = jax.block_until_ready(g_forward(x2, w1, b1, w2, b2))
    assert out2.shape == (batch2, DIM_IM)
    ref2_bf = _ref_forward_bf16(x2, w1, b1, w2, b2)
    ref2_f32 = _ref_forward_f32(x2, w1, b1, w2, b2)
    assert jnp.allclose(out2, ref2_bf, atol=2e-3), "mismatch vs bf16-matched reference (tiled)"
    assert jnp.allclose(out2, ref2_f32, atol=5e-2), "mismatch vs f32 reference (tiled)"

    print("KERNEL_OK")
</pallas_src>

<mosaic_0001>
module attributes {stable_mosaic.version = 11 : i64} {
  func.func @_g_mlp_kernel(%arg0: i32, %arg1: memref<8x20xf32, #tpu.memory_space<vmem>>, %arg2: memref<20x256xbf16, #tpu.memory_space<vmem>>, %arg3: memref<1x256xf32, #tpu.memory_space<vmem>>, %arg4: memref<256x896xbf16, #tpu.memory_space<vmem>>, %arg5: memref<1x896xf32, #tpu.memory_space<vmem>>, %arg6: memref<8x896xf32, #tpu.memory_space<vmem>>, %arg7: memref<8x256xbf16, #tpu.memory_space<vmem>>) attributes {dimension_semantics = [#tpu.dimension_semantics<parallel>], iteration_bounds = array<i64: 1>, scalar_prefetch = 0 : i64, scratch_operands = 1 : i64, tpu.core_type = #tpu.core_type<tc>, window_params = [{transform_indices = @transform_0, window_bounds = array<i64: 8, 20>}, {pipeline_mode = #tpu.pipeline_mode<synchronous>, transform_indices = @transform_1, window_bounds = array<i64: 20, 256>}, {pipeline_mode = #tpu.pipeline_mode<synchronous>, transform_indices = @transform_2, window_bounds = array<i64: 1, 256>}, {pipeline_mode = #tpu.pipeline_mode<synchronous>, transform_indices = @transform_3, window_bounds = array<i64: 256, 896>}, {pipeline_mode = #tpu.pipeline_mode<synchronous>, transform_indices = @transform_4, window_bounds = array<i64: 1, 896>}, {transform_indices = @transform_5, window_bounds = array<i64: 8, 896>}]} {
    %c0 = arith.constant 0 : index
    %c0_0 = arith.constant 0 : index
    %0 = vector.load %arg1[%c0, %c0_0] : memref<8x20xf32, #tpu.memory_space<vmem>>, vector<8x20xf32>
    %1 = arith.truncf %0 : vector<8x20xf32> to vector<8x20xbf16>
    %c0_1 = arith.constant 0 : index
    %c0_2 = arith.constant 0 : index
    %2 = vector.load %arg2[%c0_1, %c0_2] : memref<20x256xbf16, #tpu.memory_space<vmem>>, vector<20x256xbf16>
    %cst = arith.constant dense<0.000000e+00> : vector<8x256xf32>
    %3 = tpu.matmul %1, %2, %cst {dimension_numbers = #tpu.dot_dimension_numbers<[1], [0], [0], [1], [0, 0, 1, 1], [], []>} : vector<8x20xbf16>, vector<20x256xbf16>, vector<8x256xf32> -> vector<8x256xf32>
    %c0_3 = arith.constant 0 : index
    %c0_4 = arith.constant 0 : index
    %4 = vector.load %arg3[%c0_3, %c0_4] : memref<1x256xf32, #tpu.memory_space<vmem>>, vector<1x256xf32>
    %5 = vector.broadcast %4 : vector<1x256xf32> to vector<8x256xf32>
    %6 = arith.addf %3, %5 : vector<8x256xf32>
    %cst_5 = arith.constant 0.000000e+00 : f32
    %7 = vector.broadcast %cst_5 : f32 to vector<8x256xf32>
    %8 = arith.maximumf %6, %7 : vector<8x256xf32>
    %9 = arith.truncf %8 : vector<8x256xf32> to vector<8x256xbf16>
    %c0_6 = arith.constant 0 : index
    %c0_7 = arith.constant 0 : index
    %10 = vector.load %arg7[%c0_6, %c0_7] : memref<8x256xbf16, #tpu.memory_space<vmem>>, vector<8x256xbf16>
    tpu.vector_store %arg7[%c0_6, %c0_7], %9 {strides = array<i32>} : memref<8x256xbf16, #tpu.memory_space<vmem>>, vector<8x256xbf16>,
    %c0_8 = arith.constant 0 : index
    %c0_9 = arith.constant 0 : index
    %11 = vector.load %arg7[%c0_8, %c0_9] : memref<8x256xbf16, #tpu.memory_space<vmem>>, vector<8x256xbf16>
    %c0_10 = arith.constant 0 : index
    %c0_11 = arith.constant 0 : index
    %12 = vector.load %arg4[%c0_10, %c0_11] : memref<256x896xbf16, #tpu.memory_space<vmem>>, vector<256x896xbf16>
    %cst_12 = arith.constant dense<0.000000e+00> : vector<8x896xf32>
    %13 = tpu.matmul %11, %12, %cst_12 {dimension_numbers = #tpu.dot_dimension_numbers<[1], [0], [0], [1], [0, 0, 1, 1], [], []>} : vector<8x256xbf16>, vector<256x896xbf16>, vector<8x896xf32> -> vector<8x896xf32>
    %c0_13 = arith.constant 0 : index
    %c0_14 = arith.constant 0 : index
    %14 = vector.load %arg5[%c0_13, %c0_14] : memref<1x896xf32, #tpu.memory_space<vmem>>, vector<1x896xf32>
    %15 = vector.broadcast %14 : vector<1x896xf32> to vector<8x896xf32>
    %16 = arith.addf %13, %15 : vector<8x896xf32>
    %17 = arith.negf %16 : vector<8x896xf32>
    %18 = math.exp %17 : vector<8x896xf32>
    %cst_15 = arith.constant 1.000000e+00 : f32
    %19 = vector.broadcast %cst_15 : f32 to vector<8x896xf32>
    %20 = arith.addf %19, %18 : vector<8x896xf32>
    %21 = arith.divf %19, %20 : vector<8x896xf32>
    %c0_16 = arith.constant 0 : index
    %c0_17 = arith.constant 0 : index
    %22 = vector.load %arg6[%c0_16, %c0_17] : memref<8x896xf32, #tpu.memory_space<vmem>>, vector<8x896xf32>
    tpu.vector_store %arg6[%c0_16, %c0_17], %21 {strides = array<i32>} : memref<8x896xf32, #tpu.memory_space<vmem>>, vector<8x896xf32>,
    return
  }
  func.func @transform_0(%arg0: i32) -> (i32, i32) {
    %c0_i32 = arith.constant 0 : i32
    %c0_i32_0 = arith.constant 0 : i32
    return %arg0, %c0_i32 : i32, i32
  }
  func.func @transform_1(%arg0: i32) -> (i32, i32) {
    %c0_i32 = arith.constant 0 : i32
    %c0_i32_0 = arith.constant 0 : i32
    %c0_i32_1 = arith.constant 0 : i32
    return %c0_i32, %c0_i32_0 : i32, i32
  }
  func.func @transform_2(%arg0: i32) -> (i32, i32) {
    %c0_i32 = arith.constant 0 : i32
    %c0_i32_0 = arith.constant 0 : i32
    %c0_i32_1 = arith.constant 0 : i32
    return %c0_i32, %c0_i32_0 : i32, i32
  }
  func.func @transform_3(%arg0: i32) -> (i32, i32) {
    %c0_i32 = arith.constant 0 : i32
    %c0_i32_0 = arith.constant 0 : i32
    %c0_i32_1 = arith.constant 0 : i32
    return %c0_i32, %c0_i32_0 : i32, i32
  }
  func.func @transform_4(%arg0: i32) -> (i32, i32) {
    %c0_i32 = arith.constant 0 : i32
    %c0_i32_0 = arith.constant 0 : i32
    %c0_i32_1 = arith.constant 0 : i32
    return %c0_i32, %c0_i32_0 : i32, i32
  }
  func.func @transform_5(%arg0: i32) -> (i32, i32) {
    %c0_i32 = arith.constant 0 : i32
    %c0_i32_0 = arith.constant 0 : i32
    return %arg0, %c0_i32 : i32, i32
  }
}

</mosaic_0001>

<bundles_post_ra>
// kernel: tpu_custom_call.1
= control target key start
LH: loop header
LB: loop body
LE: loop exit
PB: predicated region body
PF: predicated region fallthrough
CT: control target
= control target key end

     0   :  { %10 = vsyncpa [#allocation4], 0  ;;  %s1698_s0 = inlined_call_operand.hbm [shape: f32[8,20], index: 0, kind: input, shape index: {}]   ;;  %s1699_s1 = inlined_call_operand.hbm [shape: bf16[20,256], index: 1, kind: input, shape index: {}]   ;;  %s1700_s2 = inlined_call_operand.vmem [shape: f32[1,256], index: 2, kind: input, shape index: {}]   ;;  %s1701_s3 = inlined_call_operand.hbm [shape: bf16[256,896], index: 3, kind: input, shape index: {}]   ;;  %s1702_s4 = inlined_call_operand.vmem [shape: f32[1,896], index: 4, kind: input, shape index: {}]   ;;  %s1703_s5 = inlined_call_operand.hbm [shape: f32[8,896], index: 5, kind: output, shape index: {}]  }
   0x1   :  { %11 = vsyncpa [#allocation7], 0 }
   0x2   :  { %12 = vsyncpa [#allocation5], 0  ;;  %s1582_s18 = smov [#allocation6]   ;;  %s1488_s22 = scalar_lea.hbm %s1699_s1, 384 }
   0x3   :  { %s28_s19 = sshll.u32 %s1582_s18, 4  ;;  %p1489_p0 = scmp.ne.s32.totalorder %s1699_s1, %s1488_s22  ;;  %s29_s19 = int_to_ptr.vmem [resolvable:$true] %s28_s19 }
   0x4   :  { %p1492_p1 = scmp.lt.u32.totalorder %s1488_s22, %s1699_s1 }
   0x6   :  { %p1494_p2 = pnand %p1492_p1, %p1489_p0 }
   0x8   :  { %1497 = shalt.err (!%p1494_p2)
}
   0x9   :  { %s1498_s27 = scalar_lea.vmem %s29_s19, 384  ;;  %p1503_p4 = scmp.lt.s32.totalorder %s29_s19, %s29_s19 }
   0xa   :  { %p1499_p3 = scmp.ne.s32.totalorder %s29_s19, %s1498_s27  ;;  %p1504_p5 = scmp.lt.s32.totalorder %s1498_s27, %s1498_s27 }
   0xc   :  { %p1505_p6 = por %p1504_p5, %p1503_p4 }
   0xe   :  { %p1506_p7 = pnand %p1505_p6, %p1499_p3 }
  0x10   :  { %1509 = shalt.err (!%p1506_p7)
}
  0x11   :  { %s1583_s28 = smov 128   ;;  %s1584_s29 = smov 8  }
  0x12   :  { %34 = dma.hbm_to_vmem [thread:$0]  %s1699_s1, 384, %s29_s19, [#allocation7], %s1583_s28, %s1583_s28, %s1584_s29  }
  0x13   :  { %s1585_s7 = smov [#allocation3]   ;;  %s1586_s9 = smov [#allocation8]  }
  0x14   :  { %s19_s8 = sshll.u32 %s1585_s7, 4  ;;  %s42_s10 = sshll.u32 %s1586_s9, 4  ;;  %s20_s8 = int_to_ptr.vmem [resolvable:$true] %s19_s8  ;;  %s43_s10 = int_to_ptr.vmem [resolvable:$true] %s42_s10 }
  0x15   :  { %s1510_s13 = scalar_lea.hbm %s1698_s0, 128 }
  0x16   :  { %p1511_p8 = scmp.ne.s32.totalorder %s1698_s0, %s1510_s13  ;;  %p1514_p9 = scmp.lt.u32.totalorder %s1510_s13, %s1698_s0 }
  0x18   :  { %p1516_p10 = pnand %p1514_p9, %p1511_p8 }
  0x1a   :  { %1519 = shalt.err (!%p1516_p10)
}
  0x1b   :  { %s1520_s1 = scalar_lea.vmem %s20_s8, 128  ;;  %p1525_p12 = scmp.lt.s32.totalorder %s20_s8, %s20_s8 }
  0x1c   :  { %p1521_p11 = scmp.ne.s32.totalorder %s20_s8, %s1520_s1  ;;  %p1526_p13 = scmp.lt.s32.totalorder %s1520_s1, %s1520_s1 }
  0x1e   :  { %p1527_p0 = por %p1526_p13, %p1525_p12 }
  0x20   :  { %p1528_p1 = pnand %p1527_p0, %p1521_p11 }
  0x22   :  { %1531 = shalt.err (!%p1528_p1)
}
  0x23   :  { %22 = dma.hbm_to_vmem [thread:$0]  %s1698_s0, 128, %s20_s8, [#allocation4]  }
  0x24   :  { %s1532_s22 = scalar_lea.hbm %s1701_s3, 14336 }
  0x25   :  { %p1533_p2 = scmp.ne.s32.totalorder %s1701_s3, %s1532_s22  ;;  %p1536_p3 = scmp.lt.u32.totalorder %s1532_s22, %s1701_s3 }
  0x27   :  { %p1538_p4 = pnand %p1536_p3, %p1533_p2 }
  0x29   :  { %1541 = shalt.err (!%p1538_p4)
}
  0x2a   :  { %s1542_s27 = scalar_lea.vmem %s43_s10, 14336  ;;  %p1547_p6 = scmp.lt.s32.totalorder %s43_s10, %s43_s10 }
  0x2b   :  { %p1543_p5 = scmp.ne.s32.totalorder %s43_s10, %s1542_s27  ;;  %p1548_p7 = scmp.lt.s32.totalorder %s1542_s27, %s1542_s27 }
  0x2d   :  { %p1549_p8 = por %p1548_p7, %p1547_p6 }
  0x2f   :  { %p1550_p9 = pnand %p1549_p8, %p1543_p5 }
  0x31   :  { %1553 = shalt.err (!%p1550_p9)
}
  0x32   :  { %s1587_s0 = smov 448   ;;  %s1588_s28 = smov 28  }
  0x33   :  { %48 = dma.hbm_to_vmem [thread:$0]  %s1701_s3, 14336, %s43_s10, [#allocation7], %s1587_s0, %s1587_s0, %s1588_s28  }
  0x34   :  { %1576 = dma.done.wait [#allocation4], 128  }
  0x35   :  { %1577 = vsyncadd [#allocation4], 4294967168 }
  0x36   :  { %1578 = dma.done.wait [#allocation7], 14720  }
  0x37   :  { %1579 = vsyncadd [#allocation7], 4294952576  ;;  %v1589_v0 = vmov 0   ;;  %v1295_v1 = vld [vmem:[#allocation6 + $0x4] ss:$8 sps:$4 sm:$0xff]   ;;  %vm97_vm0 = vcmask 1041408  }
  0x38   :  { %136 = vmatprep.mubr.bf16.mxu0 %v1589_v0  ;;  %v1297_v2 = vld [vmem:[#allocation6] ss:$8 sps:$4 sm:$0xff]   ;;  %v65_v3 = vld [vmem:[#allocation6 + $0x10] sm:$0x33]  ;;  %104 = vmatprep.subr.bf16.mxu0 %v1295_v1  ;;  %v1300_v6 = vld [vmem:[#allocation8 + $0x4] ss:$28 sps:$4 sm:$0xff]  }
  0x39   :  { %v1136_v4 = vcombine.high %v65_v3, %v65_v3  ;;  %v1135_v5 = vcombine.low %v65_v3, %v65_v3  ;;  %105 = vmatpush1.bf16.msra.mxu0 %v1297_v2  ;;  %v61_v7 = vld [vmem:[#allocation3] sm:$0xff]  ;;  %905 = vmatprep.subr.bf16.mxu1 %v1300_v6  ;;  %v1304_v9 = vld [vmem:[#allocation8 + $0xc] ss:$28 sps:$4 sm:$0xff]   ;;  %v1306_v11 = vld [vmem:[#allocation8 + $0x3c] ss:$28 sps:$4 sm:$0xff]   ;;  %vm93_vm1 = vcmask 162816  }
  0x3a   :  { %v1305_v10 = vld [vmem:[#allocation8] ss:$28 sps:$4 sm:$0xff]   ;;  %v62_v12 = vpack.c.bf16 %v61_v7, %v61_v7  ;;  %v1302_v13 = vld [vmem:[#allocation8 + $0x8] ss:$28 sps:$4 sm:$0xff]   ;;  %v1311_v15 = vld [vmem:[#allocation8 + $0x38] ss:$28 sps:$4 sm:$0xff]  }
  0x3b   :  { %1137 = vmatprep.subr.msk.bf16.mxu0 %vm97_vm0, %v1136_v4  ;;  %v99_v8 = vsel %vm97_vm0, %v1135_v5, 0  ;;  %906 = vmatpush1.bf16.msra.mxu1 %v1305_v10  ;;  %v1310_v14 = vld [vmem:[#allocation8 + $0x44] ss:$28 sps:$4 sm:$0xff]   ;;  %v1312_v16 = vld [vmem:[#allocation8 + $0x74] ss:$28 sps:$4 sm:$0xff]  }
  0x3c   :  { %907 = vmatprep.subr.bf16.mxu1 %v1306_v11  ;;  %v1308_v17 = vld [vmem:[#allocation8 + $0x40] ss:$28 sps:$4 sm:$0xff]   ;;  %v1317_v18 = vld [vmem:[#allocation8 + $0x70] ss:$28 sps:$4 sm:$0xff]   ;;  %v1314_v21 = vld [vmem:[#allocation8 + $0x78] ss:$28 sps:$4 sm:$0xff]   ;;  %v68_v11 = vlaneseq }
  0x3d   :  { %107 = vmatpush1.bf16.msra.mxu0 %v99_v8  ;;  %v1318_v19 = vld [vmem:[#allocation8 + $0xac] ss:$28 sps:$4 sm:$0xff]   ;;  %v1316_v20 = vld [vmem:[#allocation8 + $0x7c] ss:$28 sps:$4 sm:$0xff]   ;;  %v1324_v23 = vld [vmem:[#allocation8 + $0xe4] ss:$28 sps:$4 sm:$0xff]  }
  0x3e   :  { %946 = vmatprep.subr.bf16.mxu0 %v1304_v9  ;;  %v1323_v22 = vld [vmem:[#allocation8 + $0xa8] ss:$28 sps:$4 sm:$0xff]   ;;  %v1322_v24 = vld [vmem:[#allocation8 + $0xb4] ss:$28 sps:$4 sm:$0xff]   ;;  %v1329_v26 = vld [vmem:[#allocation8 + $0xe0] ss:$28 sps:$4 sm:$0xff]  }
  0x3f   :  { %908 = vmatpush1.bf16.msra.mxu1 %v1311_v15  ;;  %v1320_v25 = vld [vmem:[#allocation8 + $0xb0] ss:$28 sps:$4 sm:$0xff]   ;;  %v1330_v27 = vld [vmem:[#allocation8 + $0x11c] ss:$28 sps:$4 sm:$0xff]   ;;  %v1326_v29 = vld [vmem:[#allocation8 + $0xe8] ss:$28 sps:$4 sm:$0xff]  }
  0x40   :  { %1138 = vmatmul.mubr.msk.bf16.vlgmr.msra.gmra.mrb[0].mxu0 %vm93_vm1, %v62_v12  ;;  %909 = vmatprep.subr.bf16.mxu1 %v1312_v16  ;;  %v1328_v28 = vld [vmem:[#allocation8 + $0xec] ss:$28 sps:$4 sm:$0xff]   ;;  %v1335_v30 = vld [vmem:[#allocation8 + $0x118] ss:$28 sps:$4 sm:$0xff]   ;;  %v1334_v32 = vld [vmem:[#allocation8 + $0x124] ss:$28 sps:$4 sm:$0xff]  }
  0x41   :  { %947 = vmatpush1.bf16.msra.mxu0 %v1302_v13  ;;  %v1336_v31 = vld [vmem:[#allocation8 + $0x154] ss:$28 sps:$4 sm:$0xff]   ;;  %v1332_v33 = vld [vmem:[#allocation8 + $0x120] ss:$28 sps:$4 sm:$0xff]   ;;  %v1342_v35 = vld [vmem:[#allocation8 + $0x18c] ss:$28 sps:$4 sm:$0xff]  }
  0x42   :  { %948 = vmatprep.subr.bf16.mxu0 %v1310_v14  ;;  %v1341_v34 = vld [vmem:[#allocation8 + $0x150] ss:$28 sps:$4 sm:$0xff]   ;;  %v1340_v36 = vld [vmem:[#allocation8 + $0x15c] ss:$28 sps:$4 sm:$0xff]   ;;  %v1347_v38 = vld [vmem:[#allocation8 + $0x188] ss:$28 sps:$4 sm:$0xff]  }
  0x43   :  { %910 = vmatpush1.bf16.msra.mxu1 %v1317_v18  ;;  %v1338_v37 = vld [vmem:[#allocation8 + $0x158] ss:$28 sps:$4 sm:$0xff]   ;;  %v1348_v39 = vld [vmem:[#allocation8 + $0x1c4] ss:$28 sps:$4 sm:$0xff]   ;;  %v1344_v41 = vld [vmem:[#allocation8 + $0x190] ss:$28 sps:$4 sm:$0xff]  }
  0x44   :  { %911 = vmatprep.subr.bf16.mxu1 %v1318_v19  ;;  %v1346_v40 = vld [vmem:[#allocation8 + $0x194] ss:$28 sps:$4 sm:$0xff]   ;;  %v1353_v42 = vld [vmem:[#allocation8 + $0x1c0] ss:$28 sps:$4 sm:$0xff]   ;;  %v1352_v44 = vld [vmem:[#allocation8 + $0x1cc] ss:$28 sps:$4 sm:$0xff]  }
  0x45   :  { %949 = vmatpush1.bf16.msra.mxu0 %v1308_v17  ;;  %v1354_v43 = vld [vmem:[#allocation8 + $0x1fc] ss:$28 sps:$4 sm:$0xff]   ;;  %v1350_v45 = vld [vmem:[#allocation8 + $0x1c8] ss:$28 sps:$4 sm:$0xff]   ;;  %v1360_v48 = vld [vmem:[#allocation8 + $0x234] ss:$28 sps:$4 sm:$0xff]  }
  0x46   :  { %950 = vmatprep.subr.bf16.mxu0 %v1316_v20  ;;  %v1359_v46 = vld [vmem:[#allocation8 + $0x1f8] ss:$28 sps:$4 sm:$0xff]   ;;  %v1358_v47 = vld [vmem:[#allocation8 + $0x204] ss:$28 sps:$4 sm:$0xff]   ;;  %v1365_v49 = vld [vmem:[#allocation8 + $0x230] ss:$28 sps:$4 sm:$0xff]  }
  0x47   :  { %912 = vmatpush1.bf16.msra.mxu1 %v1323_v22  ;;  %v1356_v50 = vld [vmem:[#allocation8 + $0x200] ss:$28 sps:$4 sm:$0xff]   ;;  %v1366_v51 = vld [vmem:[#allocation8 + $0x26c] ss:$28 sps:$4 sm:$0xff]   ;;  %v1362_v54 = vld [vmem:[#allocation8 + $0x238] ss:$28 sps:$4 sm:$0xff]  }
  0x48   :  { %913 = vmatprep.subr.bf16.mxu1 %v1324_v23  ;;  %v1364_v52 = vld [vmem:[#allocation8 + $0x23c] ss:$28 sps:$4 sm:$0xff]   ;;  %v1371_v53 = vld [vmem:[#allocation8 + $0x268] ss:$28 sps:$4 sm:$0xff]   ;;  %v1370_v56 = vld [vmem:[#allocation8 + $0x274] ss:$28 sps:$4 sm:$0xff]  }
  0x49   :  { %951 = vmatpush1.bf16.msra.mxu0 %v1314_v21  ;;  %v1372_v55 = vld [vmem:[#allocation8 + $0x2a4] ss:$28 sps:$4 sm:$0xff]   ;;  %v1368_v58 = vld [vmem:[#allocation8 + $0x270] ss:$28 sps:$4 sm:$0xff]   ;;  %v1378_v59 = vld [vmem:[#allocation8 + $0x2dc] ss:$28 sps:$4 sm:$0xff]  }
  0x4a   :  { %952 = vmatprep.subr.bf16.mxu0 %v1322_v24  ;;  %v1377_v57 = vld [vmem:[#allocation8 + $0x2a0] ss:$28 sps:$4 sm:$0xff]   ;;  %v1376_v60 = vld [vmem:[#allocation8 + $0x2ac] ss:$28 sps:$4 sm:$0xff]   ;;  %v1383_v61 = vld [vmem:[#allocation8 + $0x2d8] ss:$28 sps:$4 sm:$0xff]  }
  0x4b   :  { %914 = vmatpush1.bf16.msra.mxu1 %v1329_v26  ;;  %v1374_v62 = vld [vmem:[#allocation8 + $0x2a8] ss:$28 sps:$4 sm:$0xff]   ;;  %v1380_v0 = vld [vmem:[#allocation8 + $0x2e0] ss:$28 sps:$4 sm:$0xff]   ;;  %v1384_v1 = vld [vmem:[#allocation8 + $0x314] ss:$28 sps:$4 sm:$0xff]  }
  0x4c   :  { %915 = vmatprep.subr.bf16.mxu1 %v1330_v27  ;;  %v1382_v63 = vld [vmem:[#allocation8 + $0x2e4] ss:$28 sps:$4 sm:$0xff]   ;;  %v1388_v2 = vld [vmem:[#allocation8 + $0x31c] ss:$28 sps:$4 sm:$0xff]   ;;  %v1389_v4 = vld [vmem:[#allocation8 + $0x310] ss:$28 sps:$4 sm:$0xff]  }
  0x4d   :  { %953 = vmatpush1.bf16.msra.mxu0 %v1320_v25  ;;  %v1386_v3 = vld [vmem:[#allocation8 + $0x318] ss:$28 sps:$4 sm:$0xff]   ;;  %v1390_v5 = vld [vmem:[#allocation8 + $0x34c] ss:$28 sps:$4 sm:$0xff]   ;;  %v1657_v12 = vshrl.u32 %v68_v11, 7  ;;  %v285_v11 = vld [vmem:[%s1702_s4] sm:$0xff] }
  0x4e   :  { %954 = vmatprep.subr.bf16.mxu0 %v1328_v28  ;;  %v1394_v6 = vld [vmem:[#allocation8 + $0x354] ss:$28 sps:$4 sm:$0xff]   ;;  %v1395_v8 = vld [vmem:[#allocation8 + $0x348] ss:$28 sps:$4 sm:$0xff]   ;;  %v66_v14 = vld [vmem:[%s1700_s2] sm:$0x3] }
  0x4f   :  { %916 = vmatpush1.bf16.msra.mxu1 %v1335_v30  ;;  %v1392_v7 = vld [vmem:[#allocation8 + $0x350] ss:$28 sps:$4 sm:$0xff]   ;;  %v1399_v10 = vld [vmem:[#allocation8 + $0x1d8] ss:$28 sps:$4 sm:$0xff]   ;;  %v70_v13 = vsub.s32 0, %v1657_v12  ;;  %v74_v15 = vsub.s32 1, %v1657_v12 }
  0x50   :  { %917 = vmatprep.subr.bf16.mxu1 %v1336_v31  ;;  %v1398_v9 = vld [vmem:[#allocation8 + $0x14] ss:$28 sps:$4 sm:$0xff]   ;;  %v1403_v30 = vld [vmem:[#allocation8 + $0x4c] ss:$28 sps:$4 sm:$0xff]   ;;  %s1590_s4 = smov [#allocation9]  }
  0x51   :  { %955 = vmatpush1.bf16.msra.mxu0 %v1326_v29  ;;  %v71_v16 = vrot.slane %v66_v14, %v70_v13  ;;  %v75_v17 = vrot.slane %v66_v14, %v74_v15  ;;  %v1396_v27 = vld [vmem:[#allocation8 + $0x10] ss:$28 sps:$4 sm:$0xff]   ;;  %v1400_v28 = vld [vmem:[#allocation8 + $0x18] ss:$28 sps:$4 sm:$0xff]   ;;  %v301_v14 = vsub.s32 3, %v1657_v12  ;;  %s1123_s8 = sshll.u32 %s1590_s4, 4  ;;  %s1124_s8 = int_to_ptr.vmem [resolvable:$true] %s1123_s8 }
  0x52   :  { %956 = vmatprep.subr.bf16.mxu0 %v1334_v32  ;;  %v1404_v31 = vld [vmem:[#allocation8 + $0x210] ss:$28 sps:$4 sm:$0xff]   ;;  %v1401_v32 = vld [vmem:[#allocation8 + $0x48] ss:$28 sps:$4 sm:$0xff]   ;;  %s1554_s9 = scalar_lea.vmem %s1124_s8, 896  ;;  %p1559_p11 = scmp.lt.s32.totalorder %s1124_s8, %s1124_s8 }
  0x53   :  { %918 = vmatpush1.bf16.msra.mxu1 %v1341_v34  ;;  %v1408_v34 = vld [vmem:[#allocation8 + $0x84] ss:$28 sps:$4 sm:$0xff]   ;;  %p1555_p10 = scmp.ne.s32.totalorder %s1124_s8, %s1554_s9  ;;  %p1560_p12 = scmp.lt.s32.totalorder %s1554_s9, %s1554_s9 }
  0x54   :  { %919 = vmatprep.subr.bf16.mxu1 %v1342_v35  ;;  %v1409_v35 = vld [vmem:[#allocation8 + $0x248] ss:$28 sps:$4 sm:$0xff]  }
  0x55   :  { %957 = vmatpush1.bf16.msra.mxu0 %v1332_v33  ;;  %v1405_v33 = vld [vmem:[#allocation8 + $0x50] ss:$28 sps:$4 sm:$0xff]   ;;  %p1561_p13 = por %p1560_p12, %p1559_p11 }
  0x56   :  { %958 = vmatprep.subr.bf16.mxu0 %v1340_v36  ;;  %v1406_v36 = vld [vmem:[#allocation8 + $0x80] ss:$28 sps:$4 sm:$0xff]  }
  0x57   :  { %920 = vmatpush1.bf16.msra.mxu1 %v1347_v38  ;;  %v1413_v38 = vld [vmem:[#allocation8 + $0xbc] ss:$28 sps:$4 sm:$0xff]   ;;  %p1562_p0 = pnand %p1561_p13, %p1555_p10 }
  0x58   :  { %921 = vmatprep.subr.bf16.mxu1 %v1348_v39  ;;  %v1414_v39 = vld [vmem:[#allocation8 + $0x280] ss:$28 sps:$4 sm:$0xff]  }
  0x59   :  { %959 = vmatpush1.bf16.msra.mxu0 %v1338_v37  ;;  %v1410_v37 = vld [vmem:[#allocation8 + $0x88] ss:$28 sps:$4 sm:$0xff]  }
  0x5a   :  { %960 = vmatprep.subr.bf16.mxu0 %v1346_v40  ;;  %v1411_v40 = vld [vmem:[#allocation8 + $0xb8] ss:$28 sps:$4 sm:$0xff]  }
  0x5b   :  { %922 = vmatpush1.bf16.msra.mxu1 %v1353_v42  ;;  %v1418_v42 = vld [vmem:[#allocation8 + $0xf4] ss:$28 sps:$4 sm:$0xff]  }
  0x5c   :  { %923 = vmatprep.subr.bf16.mxu1 %v1354_v43  ;;  %v1419_v43 = vld [vmem:[#allocation8 + $0x2b8] ss:$28 sps:$4 sm:$0xff]  }
  0x5d   :  { %961 = vmatpush1.bf16.msra.mxu0 %v1344_v41  ;;  %v1415_v41 = vld [vmem:[#allocation8 + $0xc0] ss:$28 sps:$4 sm:$0xff]  }
  0x5e   :  { %962 = vmatprep.subr.bf16.mxu0 %v1352_v44  ;;  %v1416_v44 = vld [vmem:[#allocation8 + $0xf0] ss:$28 sps:$4 sm:$0xff]  }
  0x5f   :  { %924 = vmatpush1.bf16.msra.mxu1 %v1359_v46  ;;  %v1423_v46 = vld [vmem:[#allocation8 + $0x12c] ss:$28 sps:$4 sm:$0xff]  }
  0x60   :  { %925 = vmatprep.subr.bf16.mxu1 %v1360_v48  ;;  %v1421_v48 = vld [vmem:[#allocation8 + $0x128] ss:$28 sps:$4 sm:$0xff]  }
  0x61   :  { %963 = vmatpush1.bf16.msra.mxu0 %v1350_v45  ;;  %v1420_v45 = vld [vmem:[#allocation8 + $0xf8] ss:$28 sps:$4 sm:$0xff]  }
  0x62   :  { %964 = vmatprep.subr.bf16.mxu0 %v1358_v47  ;;  %v1424_v47 = vld [vmem:[#allocation8 + $0x2f0] ss:$28 sps:$4 sm:$0xff]  }
  0x63   :  { %926 = vmatpush1.bf16.msra.mxu1 %v1365_v49  ;;  %v1425_v49 = vld [vmem:[#allocation8 + $0x130] ss:$28 sps:$4 sm:$0xff]  }
  0x64   :  { %927 = vmatprep.subr.bf16.mxu1 %v1366_v51  ;;  %v1429_v51 = vld [vmem:[#allocation8 + $0x328] ss:$28 sps:$4 sm:$0xff]  }
  0x65   :  { %965 = vmatpush1.bf16.msra.mxu0 %v1356_v50  ;;  %v1428_v50 = vld [vmem:[#allocation8 + $0x164] ss:$28 sps:$4 sm:$0xff]  }
  0x66   :  { %966 = vmatprep.subr.bf16.mxu0 %v1364_v52  ;;  %v1426_v52 = vld [vmem:[#allocation8 + $0x160] ss:$28 sps:$4 sm:$0xff]  }
  0x67   :  { %928 = vmatpush1.bf16.msra.mxu1 %v1371_v53  ;;  %v1430_v53 = vld [vmem:[#allocation8 + $0x168] ss:$28 sps:$4 sm:$0xff]  }
  0x68   :  { %929 = vmatprep.subr.bf16.mxu1 %v1372_v55  ;;  %v1434_v55 = vld [vmem:[#allocation8 + $0x360] ss:$28 sps:$4 sm:$0xff]  }
  0x69   :  { %967 = vmatpush1.bf16.msra.mxu0 %v1362_v54  ;;  %v1433_v54 = vld [vmem:[#allocation8 + $0x19c] ss:$28 sps:$4 sm:$0xff]  }
  0x6a   :  { %968 = vmatprep.subr.bf16.mxu0 %v1370_v56  ;;  %v1431_v56 = vld [vmem:[#allocation8 + $0x198] ss:$28 sps:$4 sm:$0xff]  }
  0x6b   :  { %930 = vmatpush1.bf16.msra.mxu1 %v1377_v57  ;;  %v1435_v57 = vld [vmem:[#allocation8 + $0x1a0] ss:$28 sps:$4 sm:$0xff]  }
  0x6c   :  { %931 = vmatprep.subr.bf16.mxu1 %v1378_v59  ;;  %v1436_v59 = vld [vmem:[#allocation8 + $0x1d0] ss:$28 sps:$4 sm:$0xff]  }
  0x6d   :  { %969 = vmatpush1.bf16.msra.mxu0 %v1368_v58  ;;  %v1438_v58 = vld [vmem:[#allocation8 + $0x1d4] ss:$28 sps:$4 sm:$0xff]  }
  0x6e   :  { %970 = vmatprep.subr.bf16.mxu0 %v1376_v60  ;;  %v1441_v60 = vld [vmem:[#allocation8 + $0x20c] ss:$28 sps:$4 sm:$0xff]  }
  0x6f   :  { %932 = vmatpush1.bf16.msra.mxu1 %v1383_v61  ;;  %v1439_v61 = vld [vmem:[#allocation8 + $0x208] ss:$28 sps:$4 sm:$0xff]  }
  0x70   :  { %933 = vmatprep.subr.bf16.mxu1 %v1384_v1  ;;  %v1445_v1 = vld [vmem:[#allocation8 + $0x278] ss:$28 sps:$4 sm:$0xff]  }
  0x71   :  { %971 = vmatpush1.bf16.msra.mxu0 %v1374_v62  ;;  %v1444_v62 = vld [vmem:[#allocation8 + $0x244] ss:$28 sps:$4 sm:$0xff]  }
  0x72   :  { %972 = vmatprep.subr.bf16.mxu0 %v1382_v63  ;;  %v1442_v63 = vld [vmem:[#allocation8 + $0x240] ss:$28 sps:$4 sm:$0xff]  }
  0x73   :  { %934 = vmatpush1.bf16.msra.mxu1 %v1389_v4  ;;  %v1453_v4 = vld [vmem:[#allocation8 + $0x2ec] ss:$28 sps:$4 sm:$0xff]  }
  0x74   :  { %935 = vmatprep.subr.bf16.mxu1 %v1390_v5  ;;  %v1451_v5 = vld [vmem:[#allocation8 + $0x2e8] ss:$28 sps:$4 sm:$0xff]  }
  0x75   :  { %973 = vmatpush1.bf16.msra.mxu0 %v1380_v0  ;;  %v1447_v0 = vld [vmem:[#allocation8 + $0x27c] ss:$28 sps:$4 sm:$0xff]  }
  0x76   :  { %974 = vmatprep.subr.bf16.mxu0 %v1388_v2  ;;  %v1450_v2 = vld [vmem:[#allocation8 + $0x2b4] ss:$28 sps:$4 sm:$0xff]  }
  0x77   :  { %936 = vmatpush1.bf16.msra.mxu1 %v1395_v8  ;;  %v1459_v8 = vld [vmem:[#allocation8 + $0x35c] ss:$28 sps:$4 sm:$0xff]  }
  0x78   :  { %987 = vmatprep.subr.bf16.mxu1 %v1398_v9  ;;  %v1457_v9 = vld [vmem:[#allocation8 + $0x358] ss:$28 sps:$4 sm:$0xff]  }
  0x79   :  { %975 = vmatpush1.bf16.msra.mxu0 %v1386_v3  ;;  %v1448_v3 = vld [vmem:[#allocation8 + $0x2b0] ss:$28 sps:$4 sm:$0xff]  }
  0x7a   :  { %976 = vmatprep.subr.bf16.mxu0 %v1394_v6  ;;  %v1456_v6 = vld [vmem:[#allocation8 + $0x324] ss:$28 sps:$4 sm:$0xff]  }
  0x7d   :  { %977 = vmatpush1.bf16.msra.mxu0 %v1392_v7  ;;  %v1454_v7 = vld [vmem:[#allocation8 + $0x320] ss:$28 sps:$4 sm:$0xff]  }
  0x7e   :  { %1264 = vmatprep.subr.bf16.mxu0 %v1399_v10  ;;  %v297_v10 = vsub.s32 2, %v1657_v12 }
 0x113   :  { %v138_v18 = vpop.f32.mrb[0].mxu0 }
 0x114   :  { %v139_v19 = vadd.f32 %v138_v18, %v71_v16  ;;  %v140_v20 = vpop.f32.mrb[1].mxu0  ;;  %v290_v16 = vrot.slane %v285_v11, %v70_v13  ;;  %v294_v18 = vrot.slane %v285_v11, %v74_v15 }
 0x115   :  { %v141_v21 = vadd.f32 %v140_v20, %v75_v17  ;;  %v142_v22 = vpop.f32.mrb[2].mxu0  ;;  %v298_v17 = vrot.slane %v285_v11, %v297_v10 }
 0x116   :  { %v145_v23 = vmax.f32 %v139_v19, 0.0  ;;  %v143_v24 = vpop.f32.mrb[3].mxu0  ;;  %v302_v19 = vrot.slane %v285_v11, %v301_v14 }
 0x117   :  { %v146_v25 = vmax.f32 %v141_v21, 0.0 }
 0x118   :  { %v1668_v29 = vpack.c.bf16 %v145_v23, %v145_v23 }
 0x119   :  { %v1263_v26 = vpack.c.bf16 %v146_v25, %v146_v25 }
 0x11b   :  { %937 = vmatprep.mubr.bf16.mxu1 %v1263_v26  ;;  %978 = vmatprep.mubr.bf16.mxu0 %v1263_v26 }
 0x11c   :  { %938 = vmatmul.mubr.bf16.vlgmr.msra.gmra.mrb[0].mxu1 %v1668_v29  ;;  %979 = vmatmul.mubr.bf16.vlgmr.msra.gmra.mrb[4].mxu0 %v1668_v29 }
 0x11d   :  { %988 = vmatpush1.bf16.msra.mxu1 %v1396_v27  ;;  %1265 = vmatpush3.bf16.msra.mxu0 %v1400_v28 }
 0x11e   :  { %1019 = vmatprep.mubr.bf16.mxu1 %v1263_v26  ;;  %1060 = vmatprep.mubr.bf16.mxu0 %v1263_v26 }
 0x11f   :  { %989 = vmatprep.subr.bf16.mxu1 %v1403_v30  ;;  %1266 = vmatprep.subr.bf16.mxu0 %v1404_v31 }
 0x121   :  { %990 = vmatpush1.bf16.msra.mxu1 %v1401_v32  ;;  %1267 = vmatpush3.bf16.msra.mxu0 %v1405_v33 }
 0x122   :  { %991 = vmatprep.subr.bf16.mxu1 %v1408_v34  ;;  %1268 = vmatprep.subr.bf16.mxu0 %v1409_v35 }
 0x125   :  { %992 = vmatpush1.bf16.msra.mxu1 %v1406_v36  ;;  %1269 = vmatpush3.bf16.msra.mxu0 %v1410_v37 }
 0x126   :  { %993 = vmatprep.subr.bf16.mxu1 %v1413_v38  ;;  %1270 = vmatprep.subr.bf16.mxu0 %v1414_v39 }
 0x129   :  { %994 = vmatpush1.bf16.msra.mxu1 %v1411_v40  ;;  %1271 = vmatpush3.bf16.msra.mxu0 %v1415_v41 }
 0x12a   :  { %995 = vmatprep.subr.bf16.mxu1 %v1418_v42  ;;  %1272 = vmatprep.subr.bf16.mxu0 %v1419_v43  ;;  %v313_v43 = vsub.s32 6, %v1657_v12 }
 0x12d   :  { %996 = vmatpush1.bf16.msra.mxu1 %v1416_v44  ;;  %1273 = vmatpush3.bf16.msra.mxu0 %v1420_v45 }
 0x12e   :  { %997 = vmatprep.subr.bf16.mxu1 %v1423_v46  ;;  %1274 = vmatprep.subr.bf16.mxu0 %v1424_v47 }
 0x131   :  { %998 = vmatpush1.bf16.msra.mxu1 %v1421_v48  ;;  %1275 = vmatpush3.bf16.msra.mxu0 %v1425_v49  ;;  %v314_v48 = vrot.slane %v285_v11, %v313_v43 }
 0x132   :  { %999 = vmatprep.subr.bf16.mxu1 %v1428_v50  ;;  %1276 = vmatprep.subr.bf16.mxu0 %v1429_v51 }
 0x135   :  { %1000 = vmatpush1.bf16.msra.mxu1 %v1426_v52  ;;  %1277 = vmatpush3.bf16.msra.mxu0 %v1430_v53 }
 0x136   :  { %1001 = vmatprep.subr.bf16.mxu1 %v1433_v54  ;;  %1278 = vmatprep.subr.bf16.mxu0 %v1434_v55 }
 0x139   :  { %1002 = vmatpush1.bf16.msra.mxu1 %v1431_v56  ;;  %1279 = vmatpush3.bf16.msra.mxu0 %v1435_v57  ;;  %v305_v57 = vsub.s32 4, %v1657_v12 }
 0x13a   :  { %1003 = vmatprep.subr.bf16.mxu1 %v1438_v58  ;;  %v309_v58 = vsub.s32 5, %v1657_v12 }
 0x13c   :  { %1061 = vmatmul.mubr.bf16.vlgmr.msra.gmra.mrb[8].mxu0 %v1668_v29 }
 0x13d   :  { %1004 = vmatpush1.bf16.msra.mxu1 %v1436_v59  ;;  %v306_v59 = vrot.slane %v285_v11, %v305_v57 }
 0x13e   :  { %1005 = vmatprep.subr.bf16.mxu1 %v1441_v60  ;;  %v310_v60 = vrot.slane %v285_v11, %v309_v58 }
 0x141   :  { %1006 = vmatpush1.bf16.msra.mxu1 %v1439_v61 }
 0x142   :  { %1007 = vmatprep.subr.bf16.mxu1 %v1444_v62 }
 0x145   :  { %1008 = vmatpush1.bf16.msra.mxu1 %v1442_v63 }
 0x146   :  { %1009 = vmatprep.subr.bf16.mxu1 %v1447_v0 }
 0x149   :  { %1010 = vmatpush1.bf16.msra.mxu1 %v1445_v1 }
 0x14a   :  { %1011 = vmatprep.subr.bf16.mxu1 %v1450_v2 }
 0x14d   :  { %1012 = vmatpush1.bf16.msra.mxu1 %v1448_v3 }
 0x14e   :  { %1013 = vmatprep.subr.bf16.mxu1 %v1453_v4 }
 0x151   :  { %1014 = vmatpush1.bf16.msra.mxu1 %v1451_v5 }
 0x152   :  { %1015 = vmatprep.subr.bf16.mxu1 %v1456_v6 }
 0x155   :  { %1016 = vmatpush1.bf16.msra.mxu1 %v1454_v7 }
 0x156   :  { %1017 = vmatprep.subr.bf16.mxu1 %v1459_v8 }
 0x159   :  { %1018 = vmatpush1.bf16.msra.mxu1 %v1457_v9 }
 0x15c   :  { %1020 = vmatmul.mubr.bf16.vlgmr.msra.gmra.mrb[4].mxu1 %v1668_v29 }
 0x1ef   :  { %v939_v20 = vpop.f32.mrb[0].mxu1  ;;  %v980_v21 = vpop.f32.mrb[4].mxu0 }
 0x1f0   :  { %v940_v22 = vadd.f32 %v939_v20, %v290_v16  ;;  %v981_v23 = vadd.f32 %v980_v21, %v298_v17  ;;  %v941_v24 = vpop.f32.mrb[1].mxu1  ;;  %v982_v25 = vpop.f32.mrb[5].mxu0 }
 0x1f1   :  { %v942_v26 = vadd.f32 %v941_v24, %v294_v18  ;;  %v983_v27 = vadd.f32 %v982_v25, %v302_v19  ;;  %v943_v28 = vpop.f32.mrb[2].mxu1  ;;  %v984_v29 = vpop.f32.mrb[6].mxu0 }
 0x1f2   :  { %v1254_v30 = vmul.f32 -1.442695, %v940_v22  ;;  %v1256_v31 = vmul.f32 -1.442695, %v981_v23  ;;  %v944_v32 = vpop.f32.mrb[3].mxu1  ;;  %v985_v33 = vpop.f32.mrb[7].mxu0 }
 0x1f3   :  { %v1255_v13 = vmul.f32 -1.442695, %v942_v26  ;;  %v1257_v34 = vmul.f32 -1.442695, %v983_v27 }
 0x1f4   :  { %1460 = vpow2.f32 %v1254_v30 }
 0x1f5   :  { %1462 = vpow2.f32 %v1256_v31 }
 0x1f6   :  { %1464 = vpow2.f32 %v1255_v13 }
 0x1f7   :  { %1466 = vpow2.f32 %v1257_v34 }
 0x1fe   :  { %v1461_v15 = vpop.eup %1460 }
 0x1ff   :  { %v1463_v35 = vpop.eup %1462  ;;  %v1089_v36 = vadd.f32 1.0, %v1461_v15 }
 0x200   :  { %v1465_v37 = vpop.eup %1464  ;;  %v1091_v38 = vadd.f32 1.0, %v1463_v35 }
 0x201   :  { %v1467_v39 = vpop.eup %1466  ;;  %1468 = vrcp.f32 %v1089_v36  ;;  %v1090_v40 = vadd.f32 1.0, %v1465_v37 }
 0x202   :  { %1470 = vrcp.f32 %v1091_v38  ;;  %v1092_v41 = vadd.f32 1.0, %v1467_v39 }
 0x203   :  { %1472 = vrcp.f32 %v1090_v40 }
 0x204   :  { %1474 = vrcp.f32 %v1092_v41 }
 0x20b   :  { %v1469_v42 = vpop.eup %1468 }
 0x20c   :  { %v1471_v44 = vpop.eup %1470  ;;  %1110 = vst [vmem:[#allocation9] sm:$0xff] %v1469_v42 }
 0x20d   :  { %v1473_v45 = vpop.eup %1472  ;;  %1112 = vst [vmem:[#allocation9 + $0x10] sm:$0xff] %v1471_v44 }
 0x20e   :  { %v1475_v46 = vpop.eup %1474  ;;  %1111 = vst [vmem:[#allocation9 + $0x8] sm:$0xff] %v1473_v45 }
 0x20f   :  { %1113 = vst [vmem:[#allocation9 + $0x18] sm:$0xff] %v1475_v46  ;;  %v1280_v47 = vpop.f32.mrb[8].mxu0 }
 0x210   :  { %v1281_v49 = vpop.f32.mrb[9].mxu0 }
 0x211   :  { %v1282_v50 = vadd.f32 %v1281_v49, %v1280_v47  ;;  %v1283_v51 = vpop.f32.mrb[10].mxu0 }
 0x212   :  { %v1284_v52 = vpop.f32.mrb[11].mxu0 }
 0x213   :  { %v1063_v53 = vadd.f32 %v1282_v50, %v314_v48 }
 0x215   :  { %v1260_v54 = vmul.f32 -1.442695, %v1063_v53 }
 0x217   :  { %1476 = vpow2.f32 %v1260_v54 }
 0x221   :  { %v1477_v55 = vpop.eup %1476 }
 0x222   :  { %v1095_v56 = vadd.f32 1.0, %v1477_v55 }
 0x224   :  { %1478 = vrcp.f32 %v1095_v56 }
 0x22e   :  { %v1479_v61 = vpop.eup %1478 }
 0x22f   :  { %1116 = vst [vmem:[#allocation9 + $0x30] sm:$0xff] %v1479_v61  ;;  %v1021_v62 = vpop.f32.mrb[4].mxu1 }
 0x230   :  { %v1022_v63 = vadd.f32 %v1021_v62, %v306_v59  ;;  %v1023_v0 = vpop.f32.mrb[5].mxu1 }
 0x231   :  { %v1024_v1 = vadd.f32 %v1023_v0, %v310_v60  ;;  %v1025_v2 = vpop.f32.mrb[6].mxu1 }
 0x232   :  { %v1258_v3 = vmul.f32 -1.442695, %v1022_v63  ;;  %v1026_v4 = vpop.f32.mrb[7].mxu1 }
 0x233   :  { %v1259_v5 = vmul.f32 -1.442695, %v1024_v1 }
 0x234   :  { %1480 = vpow2.f32 %v1258_v3 }
 0x235   :  { %1482 = vpow2.f32 %v1259_v5 }
 0x23e   :  { %v1481_v6 = vpop.eup %1480 }
 0x23f   :  { %v1483_v7 = vpop.eup %1482  ;;  %v1093_v8 = vadd.f32 1.0, %v1481_v6 }
 0x240   :  { %v1094_v9 = vadd.f32 1.0, %v1483_v7 }
 0x241   :  { %1484 = vrcp.f32 %v1093_v8 }
 0x242   :  { %1486 = vrcp.f32 %v1094_v9 }
 0x24b   :  { %v1485_v12 = vpop.eup %1484 }
 0x24c   :  { %v1487_v10 = vpop.eup %1486  ;;  %1114 = vst [vmem:[#allocation9 + $0x20] sm:$0xff] %v1485_v12 }
 0x24d   :  { %1115 = vst [vmem:[#allocation9 + $0x28] sm:$0xff] %v1487_v10 }
 0x24e   :  { %1565 = shalt.err (!%p1562_p0)
}
 0x24f   :  { %s1566_s12 = scalar_lea.hbm %s1703_s5, 896 }
 0x250   :  { %p1567_p1 = scmp.ne.s32.totalorder %s1703_s5, %s1566_s12  ;;  %p1570_p2 = scmp.lt.u32.totalorder %s1566_s12, %s1703_s5 }
 0x252   :  { %p1572_p3 = pnand %p1570_p2, %p1567_p1 }
 0x254   :  { %1575 = shalt.err (!%p1572_p3)
}
 0x255   :  { %1126 = dma.vmem_to_hbm [thread:$0]  %s1124_s8, 896, %s1703_s5, [#allocation5]  }
 0x256   :  { %1580 = dma.done.wait [#allocation5], 896  }
 0x257   :  { %1581 = vsyncadd [#allocation5], 4294966400 }
 0x258   :  { %1130 = vsyncpa [#allocation4], 1 }
 0x259   :  { %1131 = vsyncpa [#allocation7], 1 }
 0x25a   :  { %1132 = vsyncpa [#allocation5], 1 }

</bundles_post_ra>
